<compile_context>
chip_gen: v5e
topology: v5e:2x2
jax: 0.10.0
libtpu: 0.0.40
codegen_flags: <defaults>
</compile_context>

<pallas_src>
import math
from typing import Any, NamedTuple

import jax
import jax.numpy as jnp
from jax.experimental import pallas as pl
from jax.experimental.pallas import tpu as pltpu


def _round_up(n, m):
    return ((n + m - 1) // m) * m


def _hw_vmem_cap():
    """~75% of per-core VMEM (leaves compiler scratch headroom, esp. v7x)."""
    try:
        cap = int(pltpu.get_tpu_info().vmem_capacity_bytes)
    except Exception:
        cap = 64 * 1024 * 1024          # conservative (v7x-sized) fallback
    return cap * 3 // 4


# --------------------------------------------------------------------------
# Kernels
# --------------------------------------------------------------------------
def _ffn_resident_kernel(x_ref, w1_ref, b1_ref, w2_ref, b2_ref, o_ref):
    """Weights fully VMEM-resident; one grid step = one row tile."""
    h = jnp.dot(x_ref[...], w1_ref[...], preferred_element_type=jnp.float32)
    h = jnp.maximum(h + b1_ref[0], 0.0)                     # b1_ref: (1,1,d_ff_p)
    out = jnp.dot(h.astype(w2_ref.dtype), w2_ref[...],
                  preferred_element_type=jnp.float32)
    o_ref[...] = (out + b2_ref[...]).astype(o_ref.dtype)


def _ffn_stream_body(x_ref, w1_ref, b1_ref, w2_ref, b2_ref, o_ref, acc_ref):
    """One (row tile, d_ff tile) step; acc_ref may alias o_ref (f32 outputs)."""
    ff = pl.program_id(1)

    @pl.when(ff == 0)
    def _init():
        acc_ref[...] = jnp.zeros_like(acc_ref)

    h = jnp.dot(x_ref[...], w1_ref[...], preferred_element_type=jnp.float32)
    h = jnp.maximum(h + b1_ref[ff], 0.0)                    # b1 resident: (G,1,tf)
    acc_ref[...] += jnp.dot(h.astype(w2_ref.dtype), w2_ref[...],
                            preferred_element_type=jnp.float32)

    @pl.when(ff == pl.num_programs(1) - 1)
    def _finalize():
        o_ref[...] = (acc_ref[...] + b2_ref[...]).astype(o_ref.dtype)


def _ffn_stream_kernel_scratch(x_ref, w1_ref, b1_ref, w2_ref, b2_ref, o_ref,
                               acc_ref):
    _ffn_stream_body(x_ref, w1_ref, b1_ref, w2_ref, b2_ref, o_ref, acc_ref)


def _ffn_stream_kernel_f32out(x_ref, w1_ref, b1_ref, w2_ref, b2_ref, o_ref):
    # f32 output: accumulate straight into the VMEM-resident output block.
    _ffn_stream_body(x_ref, w1_ref, b1_ref, w2_ref, b2_ref, o_ref, o_ref)


# --------------------------------------------------------------------------
# Planning (pure Python, cheap — hoist/cache together with prepare_ffn_params)
# --------------------------------------------------------------------------
class FFNPlan(NamedTuple):
    M: int
    d_model: int
    d_ff: int
    d_model_p: int
    d_ff_p: int
    tm: int
    tf: int
    M_pad: int
    resident: bool
    use_scratch: bool
    compute_dtype: Any
    out_dtype: Any
    vmem_limit: int
    cost: Any


def make_ffn_plan(M, d_model, d_ff, out_dtype, *, compute_dtype=jnp.bfloat16,
                  tm=512, vmem_budget_bytes=None):
    """Pick tiles / path.  `tm` is the streaming row-tile target (raise to
    1024 on v6e for very large d_ff; ~256 is enough on v5e)."""
    cb = jnp.dtype(compute_dtype).itemsize
    ob = jnp.dtype(out_dtype).itemsize
    d_model_p = _round_up(d_model, 128)
    d_ff_128 = _round_up(d_ff, 128)
    hw_cap = _hw_vmem_cap()
    budget = hw_cap if vmem_budget_bytes is None else int(vmem_budget_bytes)

    M8 = _round_up(max(M, 1), 8)
    use_scratch = jnp.dtype(out_dtype) != jnp.dtype(jnp.float32)

    bias_bytes = 2 * (d_ff_128 + d_model_p) * 4          # double-buffer counted
    weight_bytes = 2 * d_model_p * d_ff_128 * cb          # w1 + w2, single copy

    def resident_bytes(tm_):
        return (2 * weight_bytes + bias_bytes              # weights counted 2x (pipeline bufs)
                + 2 * tm_ * d_model_p * (cb + ob)          # x + out tiles (double buffered)
                + tm_ * d_ff_128 * (4 + cb))               # fc1 intermediate f32 + cast copy

    resident = False
    tm_eff, tf_eff, d_ff_p, footprint = 8, 128, d_ff_128, 0

    # ---- weights-resident fast path (1-D row grid) ---------------------
    for cand in (1024, 768, 512, 384, 256, 128, 64, 32, 16, 8):
        tm_r = min(cand, M8)
        if resident_bytes(tm_r) <= budget:
            # Give the parallel row axis >= 2 tiles so both v7x TCs get work.
            if _round_up(max(M, 1), tm_r) // tm_r == 1 and M8 >= 16:
                tm_half = max(8, _round_up((M8 + 1) // 2, 8))
                if resident_bytes(tm_half) <= budget:
                    tm_r = tm_half
            resident = True
            tm_eff = tm_r
            tf_eff = d_ff_128
            d_ff_p = d_ff_128
            footprint = resident_bytes(tm_eff)
            break

    # ---- streaming fallback (2-D grid, d_ff reduced in VMEM) ------------
    if not resident:
        def stream_fixed(tm_):
            b = 2 * tm_ * d_model_p * (cb + ob) + bias_bytes   # x + out + biases
            if use_scratch:
                b += tm_ * d_model_p * 4                       # f32 accumulator scratch
            return b

        per_tf_col = 4 * d_model_p * cb                        # w1 + w2 tiles, double buffered

        cand_tms, c = [], min(_round_up(max(tm, 8), 8), M8)
        while c >= 8:
            cand_tms.append(c)
            c = _round_up(c // 2, 8) if c > 8 else 0

        for tm_c in cand_tms:
            avail = budget - stream_fixed(tm_c)
            if avail <= 0:
                continue
            per_tf = per_tf_col + tm_c * (4 + cb)              # + fc1 intermediate per column
            tf_c = min((avail // per_tf) // 128 * 128, d_ff_128)
            if tf_c >= 128:
                tm_eff, tf_eff = tm_c, int(tf_c)
                break
        # else: keep last-resort (8, 128)

        d_ff_p = _round_up(d_ff_128, tf_eff)
        footprint = (stream_fixed(tm_eff)
                     + (per_tf_col + tm_eff * (4 + cb)) * tf_eff)

    M_pad = _round_up(max(M, 1), tm_eff)
    vmem_limit = int(min(hw_cap, max(footprint * 5 // 4, 16 * 1024 * 1024)))

    n_row_tiles = M_pad // tm_eff
    weight_passes = 1 if resident else n_row_tiles
    cost = pl.CostEstimate(
        flops=4 * M_pad * d_model_p * d_ff_p,
        transcendentals=0,
        bytes_accessed=int(M_pad * d_model_p * (cb + ob)
                           + weight_passes * 2 * d_model_p * d_ff_p * cb
                           + (d_ff_p + d_model_p) * 4))

    return FFNPlan(M=M, d_model=d_model, d_ff=d_ff, d_model_p=d_model_p,
                   d_ff_p=d_ff_p, tm=tm_eff, tf=tf_eff, M_pad=M_pad,
                   resident=resident, use_scratch=use_scratch,
                   compute_dtype=jnp.dtype(compute_dtype),
                   out_dtype=jnp.dtype(out_dtype),
                   vmem_limit=vmem_limit, cost=cost)


def prepare_ffn_params(plan, w1, b1, w2, b2):
    """Pad + cast weights to the kernel layout.  HOIST / CACHE this across
    calls with fixed weights — it re-reads both weight matrices in XLA."""
    cd = plan.compute_dtype
    dm, dmp, df, dfp = plan.d_model, plan.d_model_p, plan.d_ff, plan.d_ff_p
    w1_p = jnp.pad(w1.astype(cd), ((0, dmp - dm), (0, dfp - df)))
    w2_p = jnp.pad(w2.astype(cd), ((0, dfp - df), (0, dmp - dm)))
    g = dfp // plan.tf
    b1_p = jnp.pad(b1.astype(jnp.float32), (0, dfp - df)).reshape(g, 1, plan.tf)
    b2_p = jnp.pad(b2.astype(jnp.float32), (0, dmp - dm)).reshape(1, dmp)
    return w1_p, b1_p, w2_p, b2_p


# --------------------------------------------------------------------------
# pallas_call wrapper
# --------------------------------------------------------------------------
def ffn_apply(plan, x, w1_p, b1_p, w2_p, b2_p):
    *lead, d_model = x.shape
    M = int(math.prod(lead)) if lead else 1
    assert d_model == plan.d_model and M == plan.M

    dmp, dfp, tm, tf = plan.d_model_p, plan.d_ff_p, plan.tm, plan.tf
    g_b1 = dfp // tf

    x2d = x.reshape(M, d_model)
    x_c = jnp.pad(x2d, ((0, plan.M_pad - M), (0, dmp - d_model))
                  ).astype(plan.compute_dtype)

    if plan.resident:
        grid = (plan.M_pad // tm,)
        in_specs = [
            pl.BlockSpec((tm, dmp), lambda i: (i, 0)),           # x rows
            pl.BlockSpec((dmp, dfp), lambda i: (0, 0)),          # w1 (resident)
            pl.BlockSpec((g_b1, 1, dfp), lambda i: (0, 0, 0)),   # b1 (resident)
            pl.BlockSpec((dfp, dmp), lambda i: (0, 0)),          # w2 (resident)
            pl.BlockSpec((1, dmp), lambda i: (0, 0)),            # b2
        ]
        out_spec = pl.BlockSpec((tm, dmp), lambda i: (i, 0))
        kernel = _ffn_resident_kernel
        scratch = []
        dims = ("parallel",)
    else:
        grid = (plan.M_pad // tm, dfp // tf)
        in_specs = [
            pl.BlockSpec((tm, dmp), lambda i, j: (i, 0)),        # x rows
            pl.BlockSpec((dmp, tf), lambda i, j: (0, j)),        # w1 tile
            pl.BlockSpec((g_b1, 1, tf), lambda i, j: (0, 0, 0)), # b1 (resident)
            pl.BlockSpec((tf, dmp), lambda i, j: (j, 0)),        # w2 tile
            pl.BlockSpec((1, dmp), lambda i, j: (0, 0)),         # b2
        ]
        out_spec = pl.BlockSpec((tm, dmp), lambda i, j: (i, 0))
        if plan.use_scratch:
            kernel = _ffn_stream_kernel_scratch
            scratch = [pltpu.VMEM((tm, dmp), jnp.float32)]
        else:
            kernel = _ffn_stream_kernel_f32out
            scratch = []
        dims = ("parallel", "arbitrary")

    out2d = pl.pallas_call(
        kernel,
        out_shape=jax.ShapeDtypeStruct((plan.M_pad, dmp), plan.out_dtype),
        grid_spec=pltpu.PrefetchScalarGridSpec(
            num_scalar_prefetch=0,
            grid=grid,
            in_specs=in_specs,
            out_specs=out_spec,
            scratch_shapes=scratch),
        compiler_params=pltpu.CompilerParams(
            dimension_semantics=dims,
            vmem_limit_bytes=plan.vmem_limit),
        cost_estimate=plan.cost,
    )(x_c, w1_p, b1_p, w2_p, b2_p)

    return out2d[:M, :d_model].reshape(*lead, d_model)


def position_wise_feed_forward(x, w1, b1, w2, b2, *, compute_dtype=jnp.bfloat16,
                               tm=512, vmem_budget_bytes=None):
    """relu(x @ w1 + b1) @ w2 + b2 with f32 accumulation.

    Weights are stored transposed relative to torch.nn.Linear:
      w1: (d_model, d_ff), b1: (d_ff,), w2: (d_ff, d_model), b2: (d_model,).
    For repeated calls with fixed weights, hoist make_ffn_plan +
    prepare_ffn_params out of the hot path and call ffn_apply directly.
    """
    *lead, d_model = x.shape
    d_ff = w1.shape[1]
    assert w1.shape == (d_model, d_ff) and w2.shape == (d_ff, d_model)
    M = int(math.prod(lead)) if lead else 1

    plan = make_ffn_plan(M, d_model, d_ff, x.dtype,
                         compute_dtype=compute_dtype, tm=tm,
                         vmem_budget_bytes=vmem_budget_bytes)
    params = prepare_ffn_params(plan, w1, b1, w2, b2)
    return ffn_apply(plan, x, *params)


def init_params(key, d_model, d_ff):
    """Deterministic init mimicking nn.Linear (uniform +-1/sqrt(fan_in))."""
    k1, k2, k3, k4 = jax.random.split(key, 4)
    lim1 = 1.0 / jnp.sqrt(d_model)
    lim2 = 1.0 / jnp.sqrt(d_ff)
    w1 = jax.random.uniform(k1, (d_model, d_ff), jnp.float32, -lim1, lim1)
    b1 = jax.random.uniform(k2, (d_ff,), jnp.float32, -lim1, lim1)
    w2 = jax.random.uniform(k3, (d_ff, d_model), jnp.float32, -lim2, lim2)
    b2 = jax.random.uniform(k4, (d_model,), jnp.float32, -lim2, lim2)
    return w1, b1, w2, b2


if __name__ == "__main__":
    key = jax.random.PRNGKey(0)
    kx, kp, kx2, kp2 = jax.random.split(key, 4)

    B, S, d_model, d_ff = 2, 8, 256, 512
    x = jax.random.normal(kx, (B, S, d_model), jnp.float32)
    w1, b1, w2, b2 = init_params(kp, d_model, d_ff)
    ref = jnp.maximum(x @ w1 + b1, 0.0) @ w2 + b2

    # 1) f32, weights-resident fast path (default VMEM budget).
    out = jax.block_until_ready(position_wise_feed_forward(
        x, w1, b1, w2, b2, compute_dtype=jnp.float32))
    assert out.shape == (B, S, d_model)
    assert jnp.allclose(out, ref, atol=1e-3, rtol=1e-3), "f32 resident mismatch"

    # 2) bf16-compute / f32-accumulate resident path.
    out_bf = jax.block_until_ready(position_wise_feed_forward(x, w1, b1, w2, b2))
    assert jnp.allclose(out_bf, ref, atol=3e-2, rtol=3e-2), "bf16 resident mismatch"

    # 3) Forced weight-streaming path (tiny VMEM budget); f32 output so the
    #    kernel accumulates directly into o_ref; ragged dims exercise padding.
    B2, S2, dm2, dff2 = 2, 5, 96, 200
    x2 = jax.random.normal(kx2, (B2, S2, dm2), jnp.float32)
    w1b, b1b, w2b, b2b = init_params(kp2, dm2, dff2)
    ref2 = jnp.maximum(x2 @ w1b + b1b, 0.0) @ w2b + b2b
    out2 = jax.block_until_ready(position_wise_feed_forward(
        x2, w1b, b1b, w2b, b2b, compute_dtype=jnp.float32,
        vmem_budget_bytes=500 * 1024))
    assert out2.shape == (B2, S2, dm2)
    assert jnp.allclose(out2, ref2, atol=1e-3, rtol=1e-3), "streaming f32 mismatch"

    # 4) Forced streaming path with bf16 activations/output -> f32 scratch acc.
    xb = x.astype(jnp.bfloat16)
    ref_b = jnp.maximum(xb.astype(jnp.float32) @ w1 + b1, 0.0) @ w2 + b2
    out_b = jax.block_until_ready(position_wise_feed_forward(
        xb, w1, b1, w2, b2, vmem_budget_bytes=512 * 1024))
    assert out_b.dtype == jnp.bfloat16
    assert jnp.allclose(out_b.astype(jnp.float32), ref_b, atol=5e-2, rtol=5e-2), \
        "streaming bf16 mismatch"

    print("KERNEL_OK")
</pallas_src>

<mosaic_0001>
module attributes {stable_mosaic.version = 11 : i64} {
  func.func @_ffn_resident_kernel(%arg0: i32, %arg1: memref<8x256xf32, #tpu.memory_space<vmem>>, %arg2: memref<256x512xf32, #tpu.memory_space<vmem>>, %arg3: memref<1x1x512xf32, #tpu.memory_space<vmem>>, %arg4: memref<512x256xf32, #tpu.memory_space<vmem>>, %arg5: memref<1x256xf32, #tpu.memory_space<vmem>>, %arg6: memref<8x256xf32, #tpu.memory_space<vmem>>) attributes {dimension_semantics = [#tpu.dimension_semantics<parallel>], iteration_bounds = array<i64: 2>, scalar_prefetch = 0 : i64, scratch_operands = 0 : i64, tpu.core_type = #tpu.core_type<tc>, window_params = [{transform_indices = @transform_0, window_bounds = array<i64: 8, 256>}, {pipeline_mode = #tpu.pipeline_mode<synchronous>, transform_indices = @transform_1, window_bounds = array<i64: 256, 512>}, {pipeline_mode = #tpu.pipeline_mode<synchronous>, transform_indices = @transform_2, window_bounds = array<i64: 1, 1, 512>}, {pipeline_mode = #tpu.pipeline_mode<synchronous>, transform_indices = @transform_3, window_bounds = array<i64: 512, 256>}, {pipeline_mode = #tpu.pipeline_mode<synchronous>, transform_indices = @transform_4, window_bounds = array<i64: 1, 256>}, {transform_indices = @transform_5, window_bounds = array<i64: 8, 256>}]} {
    %c0 = arith.constant 0 : index
    %c0_0 = arith.constant 0 : index
    %0 = vector.load %arg1[%c0, %c0_0] : memref<8x256xf32, #tpu.memory_space<vmem>>, vector<8x256xf32>
    %c0_1 = arith.constant 0 : index
    %c0_2 = arith.constant 0 : index
    %1 = vector.load %arg2[%c0_1, %c0_2] : memref<256x512xf32, #tpu.memory_space<vmem>>, vector<256x512xf32>
    %cst = arith.constant dense<0.000000e+00> : vector<8x512xf32>
    %2 = tpu.matmul %0, %1, %cst {dimension_numbers = #tpu.dot_dimension_numbers<[1], [0], [0], [1], [0, 0, 1, 1], [], []>} : vector<8x256xf32>, vector<256x512xf32>, vector<8x512xf32> -> vector<8x512xf32>
    %c0_3 = arith.constant 0 : index
    %c0_4 = arith.constant 0 : index
    %c0_5 = arith.constant 0 : index
    %3 = vector.load %arg3[%c0_3, %c0_4, %c0_5] : memref<1x1x512xf32, #tpu.memory_space<vmem>>, vector<1x1x512xf32>
    %4 = vector.shape_cast %3 : vector<1x1x512xf32> to vector<1x512xf32>
    %5 = vector.broadcast %4 : vector<1x512xf32> to vector<8x512xf32>
    %6 = arith.addf %2, %5 : vector<8x512xf32>
    %cst_6 = arith.constant 0.000000e+00 : f32
    %7 = vector.broadcast %cst_6 : f32 to vector<8x512xf32>
    %8 = arith.maximumf %6, %7 : vector<8x512xf32>
    %c0_7 = arith.constant 0 : index
    %c0_8 = arith.constant 0 : index
    %9 = vector.load %arg4[%c0_7, %c0_8] : memref<512x256xf32, #tpu.memory_space<vmem>>, vector<512x256xf32>
    %cst_9 = arith.constant dense<0.000000e+00> : vector<8x256xf32>
    %10 = tpu.matmul %8, %9, %cst_9 {dimension_numbers = #tpu.dot_dimension_numbers<[1], [0], [0], [1], [0, 0, 1, 1], [], []>} : vector<8x512xf32>, vector<512x256xf32>, vector<8x256xf32> -> vector<8x256xf32>
    %c0_10 = arith.constant 0 : index
    %c0_11 = arith.constant 0 : index
    %11 = vector.load %arg5[%c0_10, %c0_11] : memref<1x256xf32, #tpu.memory_space<vmem>>, vector<1x256xf32>
    %12 = vector.broadcast %11 : vector<1x256xf32> to vector<8x256xf32>
    %13 = arith.addf %10, %12 : vector<8x256xf32>
    %c0_12 = arith.constant 0 : index
    %c0_13 = arith.constant 0 : index
    %14 = vector.load %arg6[%c0_12, %c0_13] : memref<8x256xf32, #tpu.memory_space<vmem>>, vector<8x256xf32>
    tpu.vector_store %arg6[%c0_12, %c0_13], %13 {strides = array<i32>} : memref<8x256xf32, #tpu.memory_space<vmem>>, vector<8x256xf32>,
    return
  }
  func.func @transform_0(%arg0: i32) -> (i32, i32) {
    %c0_i32 = arith.constant 0 : i32
    %c0_i32_0 = arith.constant 0 : i32
    return %arg0, %c0_i32 : i32, i32
  }
  func.func @transform_1(%arg0: i32) -> (i32, i32) {
    %c0_i32 = arith.constant 0 : i32
    %c0_i32_0 = arith.constant 0 : i32
    %c0_i32_1 = arith.constant 0 : i32
    return %c0_i32, %c0_i32_0 : i32, i32
  }
  func.func @transform_2(%arg0: i32) -> (i32, i32, i32) {
    %c0_i32 = arith.constant 0 : i32
    %c0_i32_0 = arith.constant 0 : i32
    %c0_i32_1 = arith.constant 0 : i32
    %c0_i32_2 = arith.constant 0 : i32
    return %c0_i32, %c0_i32_0, %c0_i32_1 : i32, i32, i32
  }
  func.func @transform_3(%arg0: i32) -> (i32, i32) {
    %c0_i32 = arith.constant 0 : i32
    %c0_i32_0 = arith.constant 0 : i32
    %c0_i32_1 = arith.constant 0 : i32
    return %c0_i32, %c0_i32_0 : i32, i32
  }
  func.func @transform_4(%arg0: i32) -> (i32, i32) {
    %c0_i32 = arith.constant 0 : i32
    %c0_i32_0 = arith.constant 0 : i32
    %c0_i32_1 = arith.constant 0 : i32
    return %c0_i32, %c0_i32_0 : i32, i32
  }
  func.func @transform_5(%arg0: i32) -> (i32, i32) {
    %c0_i32 = arith.constant 0 : i32
    %c0_i32_0 = arith.constant 0 : i32
    return %arg0, %c0_i32 : i32, i32
  }
}

</mosaic_0001>

<bundles_post_ra>
// kernel: tpu_custom_call.1
= control target key start
LH: loop header
LB: loop body
LE: loop exit
PB: predicated region body
PF: predicated region fallthrough
CT: control target
= control target key end

     0   :  { %10 = vsyncpa [#allocation3], 0  ;;  %s1522_s0 = inlined_call_operand.hbm [shape: f32[16,256], index: 0, kind: input, shape index: {}]   ;;  %s1523_s1 = inlined_call_operand.hbm [shape: f32[256,512], index: 1, kind: input, shape index: {}]   ;;  %s1524_s2 = inlined_call_operand.hbm [shape: f32[1,1,512], index: 2, kind: input, shape index: {}]   ;;  %s1525_s3 = inlined_call_operand.hbm [shape: f32[512,256], index: 3, kind: input, shape index: {}]   ;;  %s1526_s4 = inlined_call_operand.vmem [shape: f32[1,256], index: 4, kind: input, shape index: {}]   ;;  %s1527_s5 = inlined_call_operand.hbm [shape: f32[16,256], index: 5, kind: output, shape index: {}]  }
   0x1   :  { %12 = vsyncpa [#allocation3 + $0x1], 0 }
   0x2   :  { %13 = vsyncpa [#allocation6], 0 }
   0x3   :  { %14 = vsyncpa [#allocation9], 0 }
   0x4   :  { %15 = vsyncpa [#allocation4], 0 }
   0x5   :  { %17 = vsyncpa [#allocation4 + $0x1], 0  ;;  %s1343_s18 = smov 0   ;;  %s1345_s19 = smov 0  }
   0x6   :  { %s1347_s20 = smov 0   ;;  %s1349_s21 = smov 0  }
   0x7 LB: > { %s175_s24 = sshll.u32 %s1523_s1, 4  ;;  %s1367_s25 = sadd.s32 4294967295, %s1304_s21   ;;  %s1304_s21 = sphi %s1349_s21, %s1538_s21   ;;  %s1300_s20 = sphi %s1347_s20, %s1537_s20   ;;  %s1296_s19 = sphi %s1345_s19, %s1536_s19   ;;  %s1292_s18 = sphi %s1343_s18, %s1535_s18   ;;  %s176_s24 = int_to_ptr.hbm [resolvable:$true] %s175_s24 }
   0x8   : > { %p1008_p0 = scmp.ge.s32.totalorder %s1304_s21, 1  ;;  %p44_p1 = scmp.eq.s32.totalorder %s1367_s25, 0 }
   0x9   : > { %p164_p2 = scmp.lt.s32.totalorder %s1304_s21, 3  ;;  %s1306_s27 = smov [#allocation5]  }
   0xa   : > { %s177_s28 = sshll.u32 %s1306_s27, 4  ;;  %s190_s6 = sshll.u32 %s1524_s2, 4  ;;  %s178_s28 = int_to_ptr.vmem [resolvable:$true] %s177_s28  ;;  %s191_s6 = int_to_ptr.hbm [resolvable:$true] %s190_s6 }
   0xb   : > { %p1372_p3 = pnand %p1008_p0, %p164_p2  ;;  %s201_s10 = sshll.u32 %s1525_s3, 4  ;;  %s202_s10 = int_to_ptr.hbm [resolvable:$true] %s201_s10 }
   0xc   : > { %s1307_s11 = smov [#allocation7]   ;;  %s1308_s13 = smov 512  }
   0xd   : > { %p1045_p4 = pneg %p1372_p3  ;;  %s192_s12 = sshll.u32 %s1307_s11, 4  ;;  %s193_s12 = int_to_ptr.vmem [resolvable:$true] %s192_s12 }
   0xe   : > { %s1309_s14 = smov 32   ;;  %s1310_s15 = smov [#allocation8]  }
   0xf   : > { %p1384_p6 = pnand %p1045_p4, %p44_p1  ;;  %s203_s16 = sshll.u32 %s1310_s15, 4  ;;  %s204_s16 = int_to_ptr.vmem [resolvable:$true] %s203_s16 }
  0x10   : > { %s1311_s17 = smov 256   ;;  %s1312_s22 = smov 16  }
  0x11   : > { %1048 = dma.hbm_to_vmem [thread:$0]  (!%p1384_p6), %s176_s24, 16384, %s178_s28, [#allocation6], %s1308_s13, %s1308_s13, %s1309_s14  }
  0x12   : > { %1051 = dma.hbm_to_vmem [thread:$0]  (!%p1384_p6), %s191_s6, 64, %s193_s12, [#allocation6]  }
  0x13   : > { %1054 = dma.hbm_to_vmem [thread:$0]  (!%p1384_p6), %s202_s10, 16384, %s204_s16, [#allocation9], %s1311_s17, %s1311_s17, %s1312_s22  }
  0x14   : > { %s1007_s23 = sadd.s32 4294967294, %s1304_s21   ;;  %s1399_s24 = sadd.s32 1, %s1304_s21  }
  0x15   : > { %s30_s27 = sadd.s32 1, %s1300_s20  ;;  %s27_s28 = ssub.s32 %s1304_s21, %s1399_s24 }
  0x16   : > { %p37_p7 = scmp.ne.s32.totalorder %s1300_s20, %s1296_s19  ;;  %p28_p8 = scmp.eq.s32.totalorder %s27_s28, 0 }
  0x17   : > { %p38_p9 = scmp.eq.s32.totalorder %s1304_s21, 0  ;;  %p43_p10 = scmp.ne.s32.totalorder %s1296_s19, %s1292_s18 }
  0x18   : > { %p151_p11 = scmp.eq.s32.totalorder %s1367_s25, 1  ;;  %p157_p0 = scmp.eq.s32.totalorder %s1007_s23, 1 }
  0x19   : > { %s1411_s29 = scalar_select %p28_p8, %s1300_s20, %s30_s27  }
  0x1a   : > { %p1415_p12 = por %p44_p1, %p43_p10  ;;  %p1419_p13 = por %p151_p11, %p37_p7 }
  0x1b   : > { %p39_p2 = por %p38_p9, %p37_p7  ;;  %s220_s7 = sand.u32 1, %s1300_s20  }
  0x1c   : > { %p1424_p4 = por %p157_p0, %p43_p10  ;;  %p1066_p6 = scmp.lt.s32.totalorder %s1304_s21, 2 }
  0x1d   : > { %s1013_s9 = sshll.u32 %s220_s7, 4  ;;  %s1027_s10 = sshll.u32 %s1304_s21, 4 }
  0x1e   : > { %s229_s13 = scalar_lea.hbm %s1522_s0, %s1027_s10  ;;  %s224_s15 = scalar_lea.vmem [#allocation2], %s1013_s9 }
  0x1f   : > { %s231_s14 = sshll.u32 %s229_s13, 4  ;;  %s233_s16 = sshll.u32 %s224_s15, 4  ;;  %s232_s14 = int_to_ptr.hbm [resolvable:$true] %s231_s14  ;;  %s234_s16 = int_to_ptr.vmem [resolvable:$true] %s233_s16 }
  0x20   : > { %p1433_p8 = pnand %p1066_p6, %p39_p2  ;;  %s221_s22 = scalar_lea.sflag [#allocation3], %s220_s7 }
  0x21   : > { %s1200_s23 = sshra.s32 %s232_s14, 4  ;;  %s1207_s9 = scalar_lea.hbm %s1522_s0, 32  ;;  %s1201_s23 = int_to_ptr.hbm [resolvable:$true] %s1200_s23 }
  0x22   : > { %s1202_s27 = scalar_lea.hbm %s1201_s23, 16  ;;  %p1204_p9 = pneg %p1433_p8 }
  0x23   : > { %p1203_p7 = scmp.ne.s32.totalorder %s1201_s23, %s1202_s27  ;;  %p1208_p0 = scmp.lt.s32.totalorder %s1201_s23, %s1522_s0 }
  0x24   : > { %p1209_p2 = scmp.lt.s32.totalorder %s1207_s9, %s1202_s27 }
  0x25   : > { %p1205_p10 = pnand %p1204_p9, %p1203_p7 }
  0x26   : > { %p1210_p6 = por %p1209_p2, %p1208_p0 }
  0x27   : > { %p1206_p11 = pneg %p1205_p10 }
  0x29   : > { %p1211_p5 = pnand %p1210_p6, %p1206_p11 }
  0x2b   : > { %1214 = shalt.err (!%p1211_p5)
}
  0x2c   : > { %1058 = dma.hbm_to_vmem [thread:$0]  (!%p1433_p8), %s232_s14, 256, %s234_s16, %s221_s22  }
  0x2d   : > { %242 = sbr.rel (%p1372_p3) target bundleno = 405 (0x195), region = 40  ;;  %s1450_s7 = sand.u32 (!%p1372_p3), 1, %s1296_s19  }
  0x2e   : > { %s1017_s13 = sshll.u32 (!%p1372_p3), %s1450_s7, 4  ;;  %s245_s15 = scalar_lea.sflag (!%p1372_p3), [#allocation3], %s1450_s7 }
  0x2f   : > { %s1456_s23 = scalar_lea.vmem (!%p1372_p3), [#allocation2], %s1017_s13 }
  0x32   : > { %1275 = dma.done.wait (%p1415_p12), %s245_s15, 256  }
  0x33   : > { %1277 = vsyncadd (%p1415_p12), %s245_s15, 4294967040 }
  0x34   : > { %1279 = dma.done.wait (%p44_p1), [#allocation6], 16448  }
  0x35   : > { %1281 = vsyncadd (%p44_p1), [#allocation6], 4294950848 }
  0x36   : > { %1283 = dma.done.wait (%p44_p1), [#allocation9], 16384  }
  0x37   : > { %1285 = vsyncadd (%p44_p1), [#allocation9], 4294950912  ;;  %v353_v0 = vld [vmem:[#allocation5 + $0x1e0] sm:$0xff]  ;;  %v354_v1 = vld [vmem:[#allocation5 + $0x1e8] sm:$0xff]  ;;  %s1028_s14 = sshll.u32 %s1367_s25, 4  ;;  %s290_s16 = scalar_lea.vmem [#allocation10], %s1017_s13 }
  0x38   : > { %v349_v2 = vld [vmem:[#allocation5 + $0x1c0] sm:$0xff]  ;;  %431 = vmatpush.msra.mxu0 %v353_v0  ;;  %471 = vmatpush.msra.mxu2 %v354_v1  ;;  %v350_v4 = vld [vmem:[#allocation5 + $0x1c8] sm:$0xff]  ;;  %v355_v62 = vld [vmem:[#allocation5 + $0x1f0] sm:$0xff]  ;;  %s903_s27 = scalar_lea.hbm %s1527_s5, %s1028_s14  ;;  %s905_s28 = sshll.u32 %s290_s16, 4  ;;  %s906_s28 = int_to_ptr.vmem [resolvable:$true] %s905_s28 }
  0x39   : > { %v417_v3 = vld [vmem:[#allocation5 + $0x3e0] sm:$0xff]  ;;  %v418_v5 = vld [vmem:[#allocation5 + $0x3e8] sm:$0xff]  ;;  %v356_v63 = vld [vmem:[#allocation5 + $0x1f8] sm:$0xff]  ;;  %s907_s10 = sshll.u32 %s903_s27, 4  ;;  %s892_s25 = scalar_lea.sflag [#allocation4], %s1450_s7  ;;  %s908_s10 = int_to_ptr.hbm [resolvable:$true] %s907_s10 }
  0x3a   : > { %451 = vmatpush.msra.mxu1 %v417_v3  ;;  %491 = vmatpush.msra.mxu3 %v418_v5  ;;  %v345_v6 = vld [vmem:[#allocation5 + $0x1a0] sm:$0xff]  ;;  %v346_v8 = vld [vmem:[#allocation5 + $0x1a8] sm:$0xff]  ;;  %v419_v3 = vld [vmem:[#allocation5 + $0x3f0] sm:$0xff]  ;;  %s1244_s9 = sshra.s32 %s908_s10, 4  ;;  %s1250_s15 = scalar_lea.hbm %s1527_s5, 32  ;;  %s1245_s9 = int_to_ptr.hbm [resolvable:$true] %s1244_s9 }
  0x3b   : > { %v413_v7 = vld [vmem:[#allocation5 + $0x3c0] sm:$0xff]  ;;  %432 = vmatpush.msra.mxu0 %v349_v2  ;;  %472 = vmatpush.msra.mxu2 %v350_v4  ;;  %v414_v9 = vld [vmem:[#allocation5 + $0x3c8] sm:$0xff]  ;;  %v351_v2 = vld [vmem:[#allocation5 + $0x1d0] sm:$0xff]  ;;  %s1246_s11 = scalar_lea.hbm %s1245_s9, 16  ;;  %p1251_p12 = scmp.lt.s32.totalorder %s1245_s9, %s1527_s5 }
  0x3c   : > { %v409_v10 = vld [vmem:[#allocation5 + $0x3a0] sm:$0xff]  ;;  %452 = vmatpush.msra.mxu1 %v413_v7  ;;  %492 = vmatpush.msra.mxu3 %v414_v9  ;;  %v342_v12 = vld [vmem:[#allocation5 + $0x188] sm:$0xff]  ;;  %v352_v4 = vld [vmem:[#allocation5 + $0x1d8] sm:$0xff]  ;;  %p1247_p1 = scmp.ne.s32.totalorder %s1245_s9, %s1246_s11  ;;  %p1252_p8 = scmp.lt.s32.totalorder %s1250_s15, %s1246_s11 }
  0x3d   : > { %v341_v11 = vld [vmem:[#allocation5 + $0x180] sm:$0xff]  ;;  %v410_v13 = vld [vmem:[#allocation5 + $0x3a8] sm:$0xff]  ;;  %433 = vmatpush.msra.mxu0 %v345_v6  ;;  %473 = vmatpush.msra.mxu2 %v346_v8  ;;  %v420_v5 = vld [vmem:[#allocation5 + $0x3f8] sm:$0xff] }
  0x3e   : > { %v405_v14 = vld [vmem:[#allocation5 + $0x380] sm:$0xff]  ;;  %v406_v15 = vld [vmem:[#allocation5 + $0x388] sm:$0xff]  ;;  %453 = vmatpush.msra.mxu1 %v409_v10  ;;  %493 = vmatpush.msra.mxu3 %v410_v13  ;;  %v347_v6 = vld [vmem:[#allocation5 + $0x1b0] sm:$0xff]  ;;  %p1248_p3 = pnand %p1247_p1, %p1419_p13  ;;  %p1253_p7 = por %p1252_p8, %p1251_p12 }
  0x3f   : > { %v337_v16 = vld [vmem:[#allocation5 + $0x160] sm:$0xff]  ;;  %v338_v17 = vld [vmem:[#allocation5 + $0x168] sm:$0xff]  ;;  %434 = vmatpush.msra.mxu0 %v341_v11  ;;  %474 = vmatpush.msra.mxu2 %v342_v12  ;;  %v415_v7 = vld [vmem:[#allocation5 + $0x3d0] sm:$0xff] }
  0x40   : > { %v401_v18 = vld [vmem:[#allocation5 + $0x360] sm:$0xff]  ;;  %v402_v19 = vld [vmem:[#allocation5 + $0x368] sm:$0xff]  ;;  %454 = vmatpush.msra.mxu1 %v405_v14  ;;  %494 = vmatpush.msra.mxu3 %v406_v15  ;;  %v348_v8 = vld [vmem:[#allocation5 + $0x1b8] sm:$0xff]  ;;  %p1249_p5 = pneg %p1248_p3 }
  0x41   : > { %v333_v20 = vld [vmem:[#allocation5 + $0x140] sm:$0xff]  ;;  %v334_v21 = vld [vmem:[#allocation5 + $0x148] sm:$0xff]  ;;  %435 = vmatpush.msra.mxu0 %v337_v16  ;;  %475 = vmatpush.msra.mxu2 %v338_v17  ;;  %v416_v9 = vld [vmem:[#allocation5 + $0x3d8] sm:$0xff] }
  0x42   : > { %v397_v22 = vld [vmem:[#allocation5 + $0x340] sm:$0xff]  ;;  %v398_v23 = vld [vmem:[#allocation5 + $0x348] sm:$0xff]  ;;  %455 = vmatpush.msra.mxu1 %v401_v18  ;;  %495 = vmatpush.msra.mxu3 %v402_v19  ;;  %v343_v10 = vld [vmem:[#allocation5 + $0x190] sm:$0xff]  ;;  %p1254_p9 = pnand %p1253_p7, %p1249_p5 }
  0x43   : > { %v329_v24 = vld [vmem:[#allocation5 + $0x120] sm:$0xff]  ;;  %v330_v25 = vld [vmem:[#allocation5 + $0x128] sm:$0xff]  ;;  %436 = vmatpush.msra.mxu0 %v333_v20  ;;  %476 = vmatpush.msra.mxu2 %v334_v21  ;;  %v411_v11 = vld [vmem:[#allocation5 + $0x3b0] sm:$0xff] }
  0x44   : > { %v393_v26 = vld [vmem:[#allocation5 + $0x320] sm:$0xff]  ;;  %v394_v27 = vld [vmem:[#allocation5 + $0x328] sm:$0xff]  ;;  %456 = vmatpush.msra.mxu1 %v397_v22  ;;  %496 = vmatpush.msra.mxu3 %v398_v23  ;;  %v344_v12 = vld [vmem:[#allocation5 + $0x198] sm:$0xff] }
  0x45   : > { %v325_v28 = vld [vmem:[#allocation5 + $0x100] sm:$0xff]  ;;  %v326_v29 = vld [vmem:[#allocation5 + $0x108] sm:$0xff]  ;;  %437 = vmatpush.msra.mxu0 %v329_v24  ;;  %477 = vmatpush.msra.mxu2 %v330_v25  ;;  %v412_v13 = vld [vmem:[#allocation5 + $0x3b8] sm:$0xff] }
  0x46   : > { %v389_v30 = vld [vmem:[#allocation5 + $0x300] sm:$0xff]  ;;  %v390_v31 = vld [vmem:[#allocation5 + $0x308] sm:$0xff]  ;;  %457 = vmatpush.msra.mxu1 %v393_v26  ;;  %497 = vmatpush.msra.mxu3 %v394_v27  ;;  %v339_v14 = vld [vmem:[#allocation5 + $0x170] sm:$0xff] }
  0x47   : > { %v321_v32 = vld [vmem:[#allocation5 + $0xe0] sm:$0xff]  ;;  %v322_v33 = vld [vmem:[#allocation5 + $0xe8] sm:$0xff]  ;;  %438 = vmatpush.msra.mxu0 %v325_v28  ;;  %478 = vmatpush.msra.mxu2 %v326_v29  ;;  %v407_v15 = vld [vmem:[#allocation5 + $0x390] sm:$0xff] }
  0x48   : > { %v385_v34 = vld [vmem:[#allocation5 + $0x2e0] sm:$0xff]  ;;  %v386_v35 = vld [vmem:[#allocation5 + $0x2e8] sm:$0xff]  ;;  %458 = vmatpush.msra.mxu1 %v389_v30  ;;  %498 = vmatpush.msra.mxu3 %v390_v31  ;;  %v340_v16 = vld [vmem:[#allocation5 + $0x178] sm:$0xff] }
  0x49   : > { %v317_v36 = vld [vmem:[#allocation5 + $0xc0] sm:$0xff]  ;;  %v318_v37 = vld [vmem:[#allocation5 + $0xc8] sm:$0xff]  ;;  %439 = vmatpush.msra.mxu0 %v321_v32  ;;  %479 = vmatpush.msra.mxu2 %v322_v33  ;;  %v408_v17 = vld [vmem:[#allocation5 + $0x398] sm:$0xff] }
  0x4a   : > { %v381_v38 = vld [vmem:[#allocation5 + $0x2c0] sm:$0xff]  ;;  %v382_v39 = vld [vmem:[#allocation5 + $0x2c8] sm:$0xff]  ;;  %459 = vmatpush.msra.mxu1 %v385_v34  ;;  %499 = vmatpush.msra.mxu3 %v386_v35  ;;  %v335_v18 = vld [vmem:[#allocation5 + $0x150] sm:$0xff] }
  0x4b   : > { %v313_v40 = vld [vmem:[#allocation5 + $0xa0] sm:$0xff]  ;;  %v314_v41 = vld [vmem:[#allocation5 + $0xa8] sm:$0xff]  ;;  %440 = vmatpush.msra.mxu0 %v317_v36  ;;  %480 = vmatpush.msra.mxu2 %v318_v37  ;;  %v403_v19 = vld [vmem:[#allocation5 + $0x370] sm:$0xff] }
  0x4c   : > { %v377_v42 = vld [vmem:[#allocation5 + $0x2a0] sm:$0xff]  ;;  %v378_v43 = vld [vmem:[#allocation5 + $0x2a8] sm:$0xff]  ;;  %460 = vmatpush.msra.mxu1 %v381_v38  ;;  %500 = vmatpush.msra.mxu3 %v382_v39  ;;  %v336_v20 = vld [vmem:[#allocation5 + $0x158] sm:$0xff] }
  0x4d   : > { %v309_v44 = vld [vmem:[#allocation5 + $0x80] sm:$0xff]  ;;  %v310_v45 = vld [vmem:[#allocation5 + $0x88] sm:$0xff]  ;;  %441 = vmatpush.msra.mxu0 %v313_v40  ;;  %481 = vmatpush.msra.mxu2 %v314_v41  ;;  %v404_v21 = vld [vmem:[#allocation5 + $0x378] sm:$0xff] }
  0x4e   : > { %v373_v46 = vld [vmem:[#allocation5 + $0x280] sm:$0xff]  ;;  %v374_v47 = vld [vmem:[#allocation5 + $0x288] sm:$0xff]  ;;  %461 = vmatpush.msra.mxu1 %v377_v42  ;;  %501 = vmatpush.msra.mxu3 %v378_v43  ;;  %v331_v22 = vld [vmem:[#allocation5 + $0x130] sm:$0xff] }
  0x4f   : > { %v305_v48 = vld [vmem:[#allocation5 + $0x60] sm:$0xff]  ;;  %v306_v49 = vld [vmem:[#allocation5 + $0x68] sm:$0xff]  ;;  %442 = vmatpush.msra.mxu0 %v309_v44  ;;  %482 = vmatpush.msra.mxu2 %v310_v45  ;;  %v399_v23 = vld [vmem:[#allocation5 + $0x350] sm:$0xff] }
  0x50   : > { %v369_v50 = vld [vmem:[#allocation5 + $0x260] sm:$0xff]  ;;  %v370_v51 = vld [vmem:[#allocation5 + $0x268] sm:$0xff]  ;;  %462 = vmatpush.msra.mxu1 %v373_v46  ;;  %502 = vmatpush.msra.mxu3 %v374_v47  ;;  %v332_v24 = vld [vmem:[#allocation5 + $0x138] sm:$0xff] }
  0x51   : > { %v301_v52 = vld [vmem:[#allocation5 + $0x40] sm:$0xff]  ;;  %v302_v53 = vld [vmem:[#allocation5 + $0x48] sm:$0xff]  ;;  %443 = vmatpush.msra.mxu0 %v305_v48  ;;  %483 = vmatpush.msra.mxu2 %v306_v49  ;;  %v400_v25 = vld [vmem:[#allocation5 + $0x358] sm:$0xff] }
  0x52   : > { %v365_v54 = vld [vmem:[#allocation5 + $0x240] sm:$0xff]  ;;  %v366_v55 = vld [vmem:[#allocation5 + $0x248] sm:$0xff]  ;;  %463 = vmatpush.msra.mxu1 %v369_v50  ;;  %503 = vmatpush.msra.mxu3 %v370_v51  ;;  %v327_v26 = vld [vmem:[#allocation5 + $0x110] sm:$0xff] }
  0x53   : > { %v297_v56 = vld [vmem:[#allocation5 + $0x20] sm:$0xff]  ;;  %v298_v57 = vld [vmem:[#allocation5 + $0x28] sm:$0xff]  ;;  %444 = vmatpush.msra.mxu0 %v301_v52  ;;  %484 = vmatpush.msra.mxu2 %v302_v53  ;;  %v395_v27 = vld [vmem:[#allocation5 + $0x330] sm:$0xff] }
  0x54   : > { %v361_v58 = vld [vmem:[#allocation5 + $0x220] sm:$0xff]  ;;  %v362_v59 = vld [vmem:[#allocation5 + $0x228] sm:$0xff]  ;;  %464 = vmatpush.msra.mxu1 %v365_v54  ;;  %504 = vmatpush.msra.mxu3 %v366_v55  ;;  %v328_v28 = vld [vmem:[#allocation5 + $0x118] sm:$0xff] }
  0x55   : > { %v293_v60 = vld [vmem:[#allocation5] sm:$0xff]  ;;  %v294_v61 = vld [vmem:[#allocation5 + $0x8] sm:$0xff]  ;;  %445 = vmatpush.msra.mxu0 %v297_v56  ;;  %485 = vmatpush.msra.mxu2 %v298_v57  ;;  %v396_v29 = vld [vmem:[#allocation5 + $0x338] sm:$0xff] }
  0x56   : > { %465 = vmatpush.msra.mxu1 %v361_v58  ;;  %505 = vmatpush.msra.mxu3 %v362_v59  ;;  %v357_v0 = vld [vmem:[#allocation5 + $0x200] sm:$0xff]  ;;  %v358_v1 = vld [vmem:[#allocation5 + $0x208] sm:$0xff]  ;;  %v323_v31 = vld [vmem:[#allocation5 + $0xf0] sm:$0xff] }
  0x57   : > { %446 = vmatpush.msra.mxu0 %v293_v60  ;;  %486 = vmatpush.msra.mxu2 %v294_v61  ;;  %v1471_v30 = vld [vmem:[%s1456_s23] sm:$0xff]  ;;  %v324_v33 = vld [vmem:[#allocation5 + $0xf8] sm:$0xff] }
  0x58   : > { %466 = vmatpush.msra.mxu1 %v357_v0  ;;  %506 = vmatpush.msra.mxu3 %v358_v1  ;;  %v391_v32 = vld [vmem:[#allocation5 + $0x310] sm:$0xff]  ;;  %v392_v34 = vld [vmem:[#allocation5 + $0x318] sm:$0xff] }
  0x59   : > { %511 = vmatpush.msrb.mxu0 %v355_v62  ;;  %551 = vmatpush.msrb.mxu2 %v356_v63  ;;  %v319_v35 = vld [vmem:[#allocation5 + $0xd0] sm:$0xff]  ;;  %v1475_v36 = vld [vmem:[%s1456_s23 + $0x8] sm:$0xff] }
  0x5a   : > { %531 = vmatpush.msrb.mxu1 %v419_v3  ;;  %571 = vmatpush.msrb.mxu3 %v420_v5  ;;  %v387_v37 = vld [vmem:[#allocation5 + $0x2f0] sm:$0xff]  ;;  %v320_v38 = vld [vmem:[#allocation5 + $0xd8] sm:$0xff] }
  0x5b   : > { %512 = vmatpush.msrb.mxu0 %v351_v2  ;;  %552 = vmatpush.msrb.mxu2 %v352_v4  ;;  %v388_v39 = vld [vmem:[#allocation5 + $0x2f8] sm:$0xff]  ;;  %v383_v40 = vld [vmem:[#allocation5 + $0x2d0] sm:$0xff] }
  0x5c   : > { %532 = vmatpush.msrb.mxu1 %v415_v7  ;;  %572 = vmatpush.msrb.mxu3 %v416_v9  ;;  %v315_v41 = vld [vmem:[#allocation5 + $0xb0] sm:$0xff]  ;;  %v316_v42 = vld [vmem:[#allocation5 + $0xb8] sm:$0xff]  ;;  %v655_v7 = vld [vmem:[#allocation8 + $0x1e0] sm:$0xff] }
  0x5d   : > { %513 = vmatpush.msrb.mxu0 %v347_v6  ;;  %553 = vmatpush.msrb.mxu2 %v348_v8  ;;  %v384_v43 = vld [vmem:[#allocation5 + $0x2d8] sm:$0xff]  ;;  %v311_v44 = vld [vmem:[#allocation5 + $0x90] sm:$0xff]  ;;  %v623_v6 = vld [vmem:[#allocation8 + $0xe0] sm:$0xff] }
  0x5e   : > { %533 = vmatpush.msrb.mxu1 %v411_v11  ;;  %573 = vmatpush.msrb.mxu3 %v412_v13  ;;  %v379_v45 = vld [vmem:[#allocation5 + $0x2b0] sm:$0xff]  ;;  %v312_v46 = vld [vmem:[#allocation5 + $0x98] sm:$0xff]  ;;  %v687_v8 = vld [vmem:[#allocation8 + $0x2e0] sm:$0xff] }
  0x5f   : > { %514 = vmatpush.msrb.mxu0 %v343_v10  ;;  %554 = vmatpush.msrb.mxu2 %v344_v12  ;;  %v380_v47 = vld [vmem:[#allocation5 + $0x2b8] sm:$0xff]  ;;  %v307_v48 = vld [vmem:[#allocation5 + $0x70] sm:$0xff]  ;;  %v719_v9 = vld [vmem:[#allocation8 + $0x3e0] sm:$0xff] }
  0x60   : > { %534 = vmatpush.msrb.mxu1 %v407_v15  ;;  %574 = vmatpush.msrb.mxu3 %v408_v17  ;;  %v375_v49 = vld [vmem:[#allocation5 + $0x290] sm:$0xff]  ;;  %v308_v50 = vld [vmem:[#allocation5 + $0x78] sm:$0xff]  ;;  %v651_v15 = vld [vmem:[#allocation8 + $0x1c0] sm:$0xff] }
  0x61   : > { %515 = vmatpush.msrb.mxu0 %v339_v14  ;;  %555 = vmatpush.msrb.mxu2 %v340_v16  ;;  %v376_v51 = vld [vmem:[#allocation5 + $0x298] sm:$0xff]  ;;  %v303_v52 = vld [vmem:[#allocation5 + $0x50] sm:$0xff]  ;;  %v619_v14 = vld [vmem:[#allocation8 + $0xc0] sm:$0xff] }
  0x62   : > { %535 = vmatpush.msrb.mxu1 %v403_v19  ;;  %575 = vmatpush.msrb.mxu3 %v404_v21  ;;  %v371_v53 = vld [vmem:[#allocation5 + $0x270] sm:$0xff]  ;;  %v304_v54 = vld [vmem:[#allocation5 + $0x58] sm:$0xff]  ;;  %v683_v16 = vld [vmem:[#allocation8 + $0x2c0] sm:$0xff] }
  0x63   : > { %516 = vmatpush.msrb.mxu0 %v335_v18  ;;  %556 = vmatpush.msrb.mxu2 %v336_v20  ;;  %v372_v55 = vld [vmem:[#allocation5 + $0x278] sm:$0xff]  ;;  %v299_v56 = vld [vmem:[#allocation5 + $0x30] sm:$0xff]  ;;  %v715_v17 = vld [vmem:[#allocation8 + $0x3c0] sm:$0xff] }
  0x64   : > { %536 = vmatpush.msrb.mxu1 %v399_v23  ;;  %576 = vmatpush.msrb.mxu3 %v400_v25  ;;  %v367_v57 = vld [vmem:[#allocation5 + $0x250] sm:$0xff]  ;;  %v300_v58 = vld [vmem:[#allocation5 + $0x38] sm:$0xff]  ;;  %v647_v23 = vld [vmem:[#allocation8 + $0x1a0] sm:$0xff] }
  0x65   : > { %517 = vmatpush.msrb.mxu0 %v331_v22  ;;  %557 = vmatpush.msrb.mxu2 %v332_v24  ;;  %v368_v59 = vld [vmem:[#allocation5 + $0x258] sm:$0xff]  ;;  %v295_v60 = vld [vmem:[#allocation5 + $0x10] sm:$0xff]  ;;  %v615_v22 = vld [vmem:[#allocation8 + $0xa0] sm:$0xff] }
  0x66   : > { %537 = vmatpush.msrb.mxu1 %v395_v27  ;;  %577 = vmatpush.msrb.mxu3 %v396_v29  ;;  %v363_v61 = vld [vmem:[#allocation5 + $0x230] sm:$0xff]  ;;  %v296_v62 = vld [vmem:[#allocation5 + $0x18] sm:$0xff]  ;;  %v679_v24 = vld [vmem:[#allocation8 + $0x2a0] sm:$0xff] }
  0x67   : > { %518 = vmatpush.msrb.mxu0 %v327_v26  ;;  %558 = vmatpush.msrb.mxu2 %v328_v28  ;;  %v364_v63 = vld [vmem:[#allocation5 + $0x238] sm:$0xff]  ;;  %v359_v0 = vld [vmem:[#allocation5 + $0x210] sm:$0xff]  ;;  %v711_v25 = vld [vmem:[#allocation8 + $0x3a0] sm:$0xff] }
  0x68   : > { %487 = vmatmul.f32.vlgmr.msra.gmra.mxu2 %v1471_v30  ;;  %538 = vmatpush.msrb.mxu1 %v391_v32  ;;  %v360_v1 = vld [vmem:[#allocation5 + $0x218] sm:$0xff]  ;;  %v675_v32 = vld [vmem:[#allocation8 + $0x280] sm:$0xff] }
  0x69   : > { %519 = vmatpush.msrb.mxu0 %v323_v31  ;;  %559 = vmatpush.msrb.mxu2 %v324_v33  ;;  %v625_v2 = vld [vmem:[#allocation8 + $0xf0] sm:$0xff]  ;;  %v643_v31 = vld [vmem:[#allocation8 + $0x180] sm:$0xff] }
  0x6a   : > { %578 = vmatpush.msrb.mxu3 %v392_v34  ;;  %539 = vmatpush.msrb.mxu1 %v387_v37  ;;  %v657_v3 = vld [vmem:[#allocation8 + $0x1f0] sm:$0xff]  ;;  %v707_v33 = vld [vmem:[#allocation8 + $0x380] sm:$0xff] }
  0x6b   : > { %520 = vmatpush.msrb.mxu0 %v319_v35  ;;  %507 = vmatmul.f32.vlgmr.msra.gmra.mxu3 %v1475_v36  ;;  %v689_v4 = vld [vmem:[#allocation8 + $0x2f0] sm:$0xff] }
  0x6c   : > { %560 = vmatpush.msrb.mxu2 %v320_v38  ;;  %579 = vmatpush.msrb.mxu3 %v388_v39  ;;  %v721_v5 = vld [vmem:[#allocation8 + $0x3f0] sm:$0xff]  ;;  %v607_v38 = vld [vmem:[#allocation8 + $0x60] sm:$0xff] }
  0x6d   : > { %447 = vmatmul.f32.vlgmr.msra.gmra.mxu0 %v1471_v30  ;;  %540 = vmatpush.msrb.mxu1 %v383_v40  ;;  %v621_v10 = vld [vmem:[#allocation8 + $0xd0] sm:$0xff]  ;;  %v639_v39 = vld [vmem:[#allocation8 + $0x160] sm:$0xff] }
  0x6e   : > { %521 = vmatpush.msrb.mxu0 %v315_v41  ;;  %561 = vmatpush.msrb.mxu2 %v316_v42  ;;  %v653_v11 = vld [vmem:[#allocation8 + $0x1d0] sm:$0xff]  ;;  %v671_v40 = vld [vmem:[#allocation8 + $0x260] sm:$0xff] }
  0x6f   : > { %580 = vmatpush.msrb.mxu3 %v384_v43  ;;  %467 = vmatmul.f32.vlgmr.msra.gmra.mxu1 %v1475_v36  ;;  %v685_v12 = vld [vmem:[#allocation8 + $0x2d0] sm:$0xff]  ;;  %v703_v41 = vld [vmem:[#allocation8 + $0x360] sm:$0xff] }
  0x70   : > { %522 = vmatpush.msrb.mxu0 %v311_v44  ;;  %541 = vmatpush.msrb.mxu1 %v379_v45  ;;  %v717_v13 = vld [vmem:[#allocation8 + $0x3d0] sm:$0xff] }
  0x71   : > { %562 = vmatpush.msrb.mxu2 %v312_v46  ;;  %581 = vmatpush.msrb.mxu3 %v380_v47  ;;  %v617_v18 = vld [vmem:[#allocation8 + $0xb0] sm:$0xff]  ;;  %v603_v46 = vld [vmem:[#allocation8 + $0x40] sm:$0xff] }
  0x72   : > { %523 = vmatpush.msrb.mxu0 %v307_v48  ;;  %542 = vmatpush.msrb.mxu1 %v375_v49  ;;  %v649_v19 = vld [vmem:[#allocation8 + $0x1b0] sm:$0xff]  ;;  %v635_v47 = vld [vmem:[#allocation8 + $0x140] sm:$0xff] }
  0x73   : > { %563 = vmatpush.msrb.mxu2 %v308_v50  ;;  %582 = vmatpush.msrb.mxu3 %v376_v51  ;;  %v681_v20 = vld [vmem:[#allocation8 + $0x2b0] sm:$0xff]  ;;  %v667_v48 = vld [vmem:[#allocation8 + $0x240] sm:$0xff] }
  0x74   : > { %524 = vmatpush.msrb.mxu0 %v303_v52  ;;  %543 = vmatpush.msrb.mxu1 %v371_v53  ;;  %v713_v21 = vld [vmem:[#allocation8 + $0x3b0] sm:$0xff]  ;;  %v699_v49 = vld [vmem:[#allocation8 + $0x340] sm:$0xff] }
  0x75   : > { %564 = vmatpush.msrb.mxu2 %v304_v54  ;;  %583 = vmatpush.msrb.mxu3 %v372_v55  ;;  %v613_v26 = vld [vmem:[#allocation8 + $0x90] sm:$0xff]  ;;  %v599_v54 = vld [vmem:[#allocation8 + $0x20] sm:$0xff] }
  0x76   : > { %525 = vmatpush.msrb.mxu0 %v299_v56  ;;  %544 = vmatpush.msrb.mxu1 %v367_v57  ;;  %v645_v27 = vld [vmem:[#allocation8 + $0x190] sm:$0xff]  ;;  %v631_v55 = vld [vmem:[#allocation8 + $0x120] sm:$0xff] }
  0x77   : > { %565 = vmatpush.msrb.mxu2 %v300_v58  ;;  %584 = vmatpush.msrb.mxu3 %v368_v59  ;;  %v677_v28 = vld [vmem:[#allocation8 + $0x290] sm:$0xff]  ;;  %v663_v56 = vld [vmem:[#allocation8 + $0x220] sm:$0xff] }
  0x78   : > { %526 = vmatpush.msrb.mxu0 %v295_v60  ;;  %545 = vmatpush.msrb.mxu1 %v363_v61  ;;  %v709_v29 = vld [vmem:[#allocation8 + $0x390] sm:$0xff]  ;;  %v695_v57 = vld [vmem:[#allocation8 + $0x320] sm:$0xff] }
  0x79   : > { %566 = vmatpush.msrb.mxu2 %v296_v62  ;;  %585 = vmatpush.msrb.mxu3 %v364_v63  ;;  %v609_v34 = vld [vmem:[#allocation8 + $0x70] sm:$0xff]  ;;  %v595_v62 = vld [vmem:[#allocation8] sm:$0xff] }
  0x7a   : > { %527 = vmatmul.f32.vlgmr.msrb.gmra.mxu0 %v1471_v30  ;;  %567 = vmatmul.f32.vlgmr.msrb.gmra.mxu2 %v1471_v30  ;;  %v611_v30 = vld [vmem:[#allocation8 + $0x80] sm:$0xff]  ;;  %v641_v35 = vld [vmem:[#allocation8 + $0x170] sm:$0xff] }
  0x7b   : > { %546 = vmatpush.msrb.mxu1 %v359_v0  ;;  %586 = vmatpush.msrb.mxu3 %v360_v1  ;;  %v705_v37 = vld [vmem:[#allocation8 + $0x370] sm:$0xff]  ;;  %v627_v63 = vld [vmem:[#allocation8 + $0x100] sm:$0xff]  ;;  %v626_v0 = vld [vmem:[#allocation8 + $0xf8] sm:$0xff] }
  0x7c   : > { %547 = vmatmul.f32.vlgmr.msrb.gmra.mxu1 %v1475_v36  ;;  %587 = vmatmul.f32.vlgmr.msrb.gmra.mxu3 %v1475_v36  ;;  %v673_v36 = vld [vmem:[#allocation8 + $0x270] sm:$0xff]  ;;  %v658_v1 = vld [vmem:[#allocation8 + $0x1f8] sm:$0xff] }
  0x7d   : > { %729 = vmatpush.msra.mxu0 %v625_v2  ;;  %749 = vmatpush.msra.mxu1 %v657_v3  ;;  %v605_v42 = vld [vmem:[#allocation8 + $0x50] sm:$0xff]  ;;  %v659_v2 = vld [vmem:[#allocation8 + $0x200] sm:$0xff]  ;;  %v624_v3 = vld [vmem:[#allocation8 + $0xe8] sm:$0xff] }
  0x7e   : > { %769 = vmatpush.msra.mxu2 %v689_v4  ;;  %789 = vmatpush.msra.mxu3 %v721_v5  ;;  %v637_v43 = vld [vmem:[#allocation8 + $0x150] sm:$0xff]  ;;  %v656_v4 = vld [vmem:[#allocation8 + $0x1e8] sm:$0xff]  ;;  %v690_v5 = vld [vmem:[#allocation8 + $0x2f8] sm:$0xff] }
  0x7f   : > { %730 = vmatpush.msra.mxu0 %v623_v6  ;;  %750 = vmatpush.msra.mxu1 %v655_v7  ;;  %v669_v44 = vld [vmem:[#allocation8 + $0x250] sm:$0xff]  ;;  %v622_v6 = vld [vmem:[#allocation8 + $0xd8] sm:$0xff] }
  0x80   : > { %770 = vmatpush.msra.mxu2 %v687_v8  ;;  %790 = vmatpush.msra.mxu3 %v719_v9  ;;  %v701_v45 = vld [vmem:[#allocation8 + $0x350] sm:$0xff]  ;;  %v654_v7 = vld [vmem:[#allocation8 + $0x1d8] sm:$0xff]  ;;  %v688_v8 = vld [vmem:[#allocation8 + $0x2e8] sm:$0xff] }
  0x81   : > { %731 = vmatpush.msra.mxu0 %v621_v10  ;;  %751 = vmatpush.msra.mxu1 %v653_v11  ;;  %v601_v50 = vld [vmem:[#allocation8 + $0x30] sm:$0xff]  ;;  %v620_v9 = vld [vmem:[#allocation8 + $0xc8] sm:$0xff]  ;;  %v618_v11 = vld [vmem:[#allocation8 + $0xb8] sm:$0xff] }
  0x82   : > { %771 = vmatpush.msra.mxu2 %v685_v12  ;;  %791 = vmatpush.msra.mxu3 %v717_v13  ;;  %v633_v51 = vld [vmem:[#allocation8 + $0x130] sm:$0xff]  ;;  %v652_v10 = vld [vmem:[#allocation8 + $0x1c8] sm:$0xff]  ;;  %v650_v12 = vld [vmem:[#allocation8 + $0x1b8] sm:$0xff] }
  0x83   : > { %732 = vmatpush.msra.mxu0 %v619_v14  ;;  %752 = vmatpush.msra.mxu1 %v651_v15  ;;  %v665_v52 = vld [vmem:[#allocation8 + $0x230] sm:$0xff]  ;;  %v616_v13 = vld [vmem:[#allocation8 + $0xa8] sm:$0xff]  ;;  %v614_v15 = vld [vmem:[#allocation8 + $0x98] sm:$0xff] }
  0x84   : > { %772 = vmatpush.msra.mxu2 %v683_v16  ;;  %792 = vmatpush.msra.mxu3 %v715_v17  ;;  %v697_v53 = vld [vmem:[#allocation8 + $0x330] sm:$0xff]  ;;  %v648_v14 = vld [vmem:[#allocation8 + $0x1a8] sm:$0xff]  ;;  %v646_v16 = vld [vmem:[#allocation8 + $0x198] sm:$0xff] }
  0x85   : > { %733 = vmatpush.msra.mxu0 %v617_v18  ;;  %753 = vmatpush.msra.mxu1 %v649_v19  ;;  %v597_v58 = vld [vmem:[#allocation8 + $0x10] sm:$0xff]  ;;  %v612_v17 = vld [vmem:[#allocation8 + $0x88] sm:$0xff]  ;;  %v610_v18 = vld [vmem:[#allocation8 + $0x78] sm:$0xff] }
  0x86   : > { %773 = vmatpush.msra.mxu2 %v681_v20  ;;  %793 = vmatpush.msra.mxu3 %v713_v21  ;;  %v629_v59 = vld [vmem:[#allocation8 + $0x110] sm:$0xff]  ;;  %v644_v19 = vld [vmem:[#allocation8 + $0x188] sm:$0xff]  ;;  %v686_v20 = vld [vmem:[#allocation8 + $0x2d8] sm:$0xff] }
  0x87   : > { %734 = vmatpush.msra.mxu0 %v615_v22  ;;  %754 = vmatpush.msra.mxu1 %v647_v23  ;;  %v661_v60 = vld [vmem:[#allocation8 + $0x210] sm:$0xff]  ;;  %v691_v21 = vld [vmem:[#allocation8 + $0x300] sm:$0xff]  ;;  %v608_v22 = vld [vmem:[#allocation8 + $0x68] sm:$0xff] }
  0x88   : > { %774 = vmatpush.msra.mxu2 %v679_v24  ;;  %794 = vmatpush.msra.mxu3 %v711_v25  ;;  %v693_v61 = vld [vmem:[#allocation8 + $0x310] sm:$0xff]  ;;  %v642_v23 = vld [vmem:[#allocation8 + $0x178] sm:$0xff]  ;;  %v684_v24 = vld [vmem:[#allocation8 + $0x2c8] sm:$0xff] }
  0x89   : > { %735 = vmatpush.msra.mxu0 %v613_v26  ;;  %755 = vmatpush.msra.mxu1 %v645_v27  ;;  %v722_v25 = vld [vmem:[#allocation8 + $0x3f8] sm:$0xff]  ;;  %v640_v27 = vld [vmem:[#allocation8 + $0x168] sm:$0xff] }
  0x8a   : > { %775 = vmatpush.msra.mxu2 %v677_v28  ;;  %795 = vmatpush.msra.mxu3 %v709_v29  ;;  %v606_v26 = vld [vmem:[#allocation8 + $0x58] sm:$0xff]  ;;  %v720_v29 = vld [vmem:[#allocation8 + $0x3e8] sm:$0xff] }
  0x8b   : > { %736 = vmatpush.msra.mxu0 %v611_v30  ;;  %756 = vmatpush.msra.mxu1 %v643_v31  ;;  %v682_v28 = vld [vmem:[#allocation8 + $0x2b8] sm:$0xff]  ;;  %v604_v30 = vld [vmem:[#allocation8 + $0x48] sm:$0xff] }
  0x8c   : > { %776 = vmatpush.msra.mxu2 %v675_v32  ;;  %796 = vmatpush.msra.mxu3 %v707_v33  ;;  %v638_v31 = vld [vmem:[#allocation8 + $0x158] sm:$0xff]  ;;  %v680_v32 = vld [vmem:[#allocation8 + $0x2a8] sm:$0xff] }
  0x8d   : > { %737 = vmatpush.msra.mxu0 %v609_v34  ;;  %757 = vmatpush.msra.mxu1 %v641_v35  ;;  %v718_v33 = vld [vmem:[#allocation8 + $0x3d8] sm:$0xff]  ;;  %v636_v35 = vld [vmem:[#allocation8 + $0x148] sm:$0xff] }
  0x8e   : > { %777 = vmatpush.msra.mxu2 %v673_v36  ;;  %797 = vmatpush.msra.mxu3 %v705_v37  ;;  %v602_v34 = vld [vmem:[#allocation8 + $0x38] sm:$0xff]  ;;  %v716_v37 = vld [vmem:[#allocation8 + $0x3c8] sm:$0xff] }
  0x8f   : > { %738 = vmatpush.msra.mxu0 %v607_v38  ;;  %758 = vmatpush.msra.mxu1 %v639_v39  ;;  %v678_v36 = vld [vmem:[#allocation8 + $0x298] sm:$0xff]  ;;  %v600_v38 = vld [vmem:[#allocation8 + $0x28] sm:$0xff] }
  0x90   : > { %778 = vmatpush.msra.mxu2 %v671_v40  ;;  %798 = vmatpush.msra.mxu3 %v703_v41  ;;  %v634_v39 = vld [vmem:[#allocation8 + $0x138] sm:$0xff]  ;;  %v676_v40 = vld [vmem:[#allocation8 + $0x288] sm:$0xff] }
  0x91   : > { %739 = vmatpush.msra.mxu0 %v605_v42  ;;  %759 = vmatpush.msra.mxu1 %v637_v43  ;;  %v714_v41 = vld [vmem:[#allocation8 + $0x3b8] sm:$0xff]  ;;  %v632_v43 = vld [vmem:[#allocation8 + $0x128] sm:$0xff] }
  0x92   : > { %779 = vmatpush.msra.mxu2 %v669_v44  ;;  %799 = vmatpush.msra.mxu3 %v701_v45  ;;  %v598_v42 = vld [vmem:[#allocation8 + $0x18] sm:$0xff]  ;;  %v712_v45 = vld [vmem:[#allocation8 + $0x3a8] sm:$0xff] }
  0x93   : > { %740 = vmatpush.msra.mxu0 %v603_v46  ;;  %760 = vmatpush.msra.mxu1 %v635_v47  ;;  %v674_v44 = vld [vmem:[#allocation8 + $0x278] sm:$0xff]  ;;  %v596_v46 = vld [vmem:[#allocation8 + $0x8] sm:$0xff] }
  0x94   : > { %780 = vmatpush.msra.mxu2 %v667_v48  ;;  %800 = vmatpush.msra.mxu3 %v699_v49  ;;  %v630_v47 = vld [vmem:[#allocation8 + $0x118] sm:$0xff]  ;;  %v672_v48 = vld [vmem:[#allocation8 + $0x268] sm:$0xff] }
  0x95   : > { %741 = vmatpush.msra.mxu0 %v601_v50  ;;  %761 = vmatpush.msra.mxu1 %v633_v51  ;;  %v710_v49 = vld [vmem:[#allocation8 + $0x398] sm:$0xff]  ;;  %v628_v50 = vld [vmem:[#allocation8 + $0x108] sm:$0xff] }
  0x96   : > { %781 = vmatpush.msra.mxu2 %v665_v52  ;;  %801 = vmatpush.msra.mxu3 %v697_v53  ;;  %v670_v51 = vld [vmem:[#allocation8 + $0x258] sm:$0xff]  ;;  %v708_v52 = vld [vmem:[#allocation8 + $0x388] sm:$0xff] }
  0x97   : > { %742 = vmatpush.msra.mxu0 %v599_v54  ;;  %762 = vmatpush.msra.mxu1 %v631_v55  ;;  %v668_v53 = vld [vmem:[#allocation8 + $0x248] sm:$0xff]  ;;  %v706_v54 = vld [vmem:[#allocation8 + $0x378] sm:$0xff] }
  0x98   : > { %782 = vmatpush.msra.mxu2 %v663_v56  ;;  %802 = vmatpush.msra.mxu3 %v695_v57  ;;  %v666_v55 = vld [vmem:[#allocation8 + $0x238] sm:$0xff]  ;;  %v704_v56 = vld [vmem:[#allocation8 + $0x368] sm:$0xff] }
  0x99   : > { %743 = vmatpush.msra.mxu0 %v597_v58  ;;  %763 = vmatpush.msra.mxu1 %v629_v59  ;;  %v664_v57 = vld [vmem:[#allocation8 + $0x228] sm:$0xff]  ;;  %v702_v58 = vld [vmem:[#allocation8 + $0x358] sm:$0xff] }
  0x9a   : > { %783 = vmatpush.msra.mxu2 %v661_v60  ;;  %803 = vmatpush.msra.mxu3 %v693_v61  ;;  %v662_v59 = vld [vmem:[#allocation8 + $0x218] sm:$0xff]  ;;  %v700_v60 = vld [vmem:[#allocation8 + $0x348] sm:$0xff] }
  0x9b   : > { %744 = vmatpush.msra.mxu0 %v595_v62  ;;  %764 = vmatpush.msra.mxu1 %v627_v63  ;;  %v421_v61 = vld [vmem:[#allocation7] sm:$0xf]  ;;  %v660_v62 = vld [vmem:[#allocation8 + $0x208] sm:$0xff] }
  0x9c   : > { %784 = vmatpush.msra.mxu2 %v659_v2  ;;  %804 = vmatpush.msra.mxu3 %v691_v21  ;;  %v698_v63 = vld [vmem:[#allocation8 + $0x338] sm:$0xff] }
  0x9d   : > { %809 = vmatpush.msrb.mxu0 %v626_v0  ;;  %829 = vmatpush.msrb.mxu1 %v658_v1  ;;  %v696_v0 = vld [vmem:[#allocation8 + $0x328] sm:$0xff]  ;;  %v423_v1 = vperm.slane %v421_v61, 0  ;;  %v694_v2 = vld [vmem:[#allocation8 + $0x318] sm:$0xff] }
  0x9e   : > { %849 = vmatpush.msrb.mxu2 %v690_v5  ;;  %869 = vmatpush.msrb.mxu3 %v722_v25 }
  0x9f   : > { %810 = vmatpush.msrb.mxu0 %v624_v3  ;;  %830 = vmatpush.msrb.mxu1 %v656_v4  ;;  %v424_v3 = vperm.slane %v421_v61, 1  ;;  %v692_v4 = vld [vmem:[#allocation8 + $0x308] sm:$0xff] }
  0xa0   : > { %850 = vmatpush.msrb.mxu2 %v688_v8  ;;  %870 = vmatpush.msrb.mxu3 %v720_v29 }
  0xa1   : > { %811 = vmatpush.msrb.mxu0 %v622_v6  ;;  %831 = vmatpush.msrb.mxu1 %v654_v7 }
  0xa2   : > { %851 = vmatpush.msrb.mxu2 %v686_v20  ;;  %871 = vmatpush.msrb.mxu3 %v718_v33  ;;  %v426_v20 = vperm.slane %v421_v61, 3 }
  0xa3   : > { %812 = vmatpush.msrb.mxu0 %v620_v9  ;;  %832 = vmatpush.msrb.mxu1 %v652_v10 }
  0xa4   : > { %852 = vmatpush.msrb.mxu2 %v684_v24  ;;  %872 = vmatpush.msrb.mxu3 %v716_v37 }
  0xa5   : > { %813 = vmatpush.msrb.mxu0 %v618_v11  ;;  %833 = vmatpush.msrb.mxu1 %v650_v12 }
  0xa6   : > { %853 = vmatpush.msrb.mxu2 %v682_v28  ;;  %873 = vmatpush.msrb.mxu3 %v714_v41 }
  0xa7   : > { %814 = vmatpush.msrb.mxu0 %v616_v13  ;;  %834 = vmatpush.msrb.mxu1 %v648_v14 }
  0xa8   : > { %854 = vmatpush.msrb.mxu2 %v680_v32  ;;  %874 = vmatpush.msrb.mxu3 %v712_v45 }
  0xa9   : > { %815 = vmatpush.msrb.mxu0 %v614_v15  ;;  %835 = vmatpush.msrb.mxu1 %v646_v16  ;;  %v425_v15 = vperm.slane %v421_v61, 2 }
  0xaa   : > { %855 = vmatpush.msrb.mxu2 %v678_v36  ;;  %875 = vmatpush.msrb.mxu3 %v710_v49 }
  0xab   : > { %816 = vmatpush.msrb.mxu0 %v612_v17  ;;  %836 = vmatpush.msrb.mxu1 %v644_v19 }
  0xac   : > { %856 = vmatpush.msrb.mxu2 %v676_v40  ;;  %876 = vmatpush.msrb.mxu3 %v708_v52 }
  0xad   : > { %817 = vmatpush.msrb.mxu0 %v610_v18  ;;  %837 = vmatpush.msrb.mxu1 %v642_v23 }
  0xae   : > { %857 = vmatpush.msrb.mxu2 %v674_v44  ;;  %877 = vmatpush.msrb.mxu3 %v706_v54 }
  0xaf   : > { %818 = vmatpush.msrb.mxu0 %v608_v22  ;;  %838 = vmatpush.msrb.mxu1 %v640_v27  ;;  %v723_v27 = vld [vmem:[%s1526_s4] sm:$0x3] }
  0xb0   : > { %858 = vmatpush.msrb.mxu2 %v672_v48  ;;  %878 = vmatpush.msrb.mxu3 %v704_v56  ;;  %v725_v29 = vperm.slane %v723_v27, 0 }
  0xb1   : > { %819 = vmatpush.msrb.mxu0 %v606_v26  ;;  %839 = vmatpush.msrb.mxu1 %v638_v31 }
  0xb2   : > { %859 = vmatpush.msrb.mxu2 %v670_v51  ;;  %879 = vmatpush.msrb.mxu3 %v702_v58 }
  0xb3   : > { %820 = vmatpush.msrb.mxu0 %v604_v30  ;;  %840 = vmatpush.msrb.mxu1 %v636_v35 }
  0xb4   : > { %860 = vmatpush.msrb.mxu2 %v668_v53  ;;  %880 = vmatpush.msrb.mxu3 %v700_v60 }
  0xb5   : > { %821 = vmatpush.msrb.mxu0 %v602_v34  ;;  %841 = vmatpush.msrb.mxu1 %v634_v39  ;;  %v726_v34 = vperm.slane %v723_v27, 1 }
  0xb6   : > { %861 = vmatpush.msrb.mxu2 %v666_v55  ;;  %881 = vmatpush.msrb.mxu3 %v698_v63 }
  0xb7   : > { %822 = vmatpush.msrb.mxu0 %v600_v38  ;;  %842 = vmatpush.msrb.mxu1 %v632_v43 }
  0xb8   : > { %862 = vmatpush.msrb.mxu2 %v664_v57  ;;  %882 = vmatpush.msrb.mxu3 %v696_v0 }
  0xb9   : > { %823 = vmatpush.msrb.mxu0 %v598_v42  ;;  %843 = vmatpush.msrb.mxu1 %v630_v47 }
  0xba   : > { %863 = vmatpush.msrb.mxu2 %v662_v59  ;;  %883 = vmatpush.msrb.mxu3 %v694_v2 }
  0xbb   : > { %824 = vmatpush.msrb.mxu0 %v596_v46  ;;  %844 = vmatpush.msrb.mxu1 %v628_v50 }
  0xbc   : > { %864 = vmatpush.msrb.mxu2 %v660_v62  ;;  %884 = vmatpush.msrb.mxu3 %v692_v4 }
  0xea   : > { %v448_v5 = vpop.f32.mrf.mxu0 }
  0xeb   : > { %v449_v6 = vadd.f32 %v448_v5, %v423_v1  ;;  %v488_v7 = vpop.f32.mrf.mxu2 }
  0xec   : > { %v468_v8 = vpop.f32.mrf.mxu1  ;;  %v489_v9 = vadd.f32 %v488_v7, %v424_v3 }
  0xed   : > { %v469_v10 = vadd.f32 %v468_v8, %v449_v6 }
  0xee   : > { %v508_v11 = vpop.f32.mrf.mxu3 }
  0xef   : > { %v591_v12 = vmax.f32 %v469_v10, 0.0  ;;  %v509_v13 = vadd.f32 %v508_v11, %v489_v9 }
  0xf1   : > { %v592_v14 = vmax.f32 %v509_v13, 0.0  ;;  %745 = vmatmul.f32.vlgmr.msra.gmra.mxu0 %v591_v12 }
  0xf3   : > { %765 = vmatmul.f32.vlgmr.msra.gmra.mxu1 %v592_v14 }
  0xf7   : > { %v528_v16 = vpop.f32.mrf.mxu0 }
  0xf8   : > { %v529_v17 = vadd.f32 %v528_v16, %v425_v15 }
  0xf9   : > { %v548_v18 = vpop.f32.mrf.mxu1  ;;  %825 = vmatmul.f32.vlgmr.msrb.gmra.mxu0 %v591_v12 }
  0xfa   : > { %v549_v19 = vadd.f32 %v548_v18, %v529_v17 }
  0xfb   : > { %845 = vmatmul.f32.vlgmr.msrb.gmra.mxu1 %v592_v14 }
  0xfc   : > { %v593_v21 = vmax.f32 %v549_v19, 0.0 }
  0xfd   : > { %v568_v22 = vpop.f32.mrf.mxu2 }
  0xfe   : > { %v569_v23 = vadd.f32 %v568_v22, %v426_v20  ;;  %785 = vmatmul.f32.vlgmr.msra.gmra.mxu2 %v593_v21 }
  0xff   : > { %v588_v24 = vpop.f32.mrf.mxu3 }
 0x100   : > { %v589_v25 = vadd.f32 %v588_v24, %v569_v23 }
 0x102   : > { %v594_v26 = vmax.f32 %v589_v25, 0.0 }
 0x104   : > { %805 = vmatmul.f32.vlgmr.msra.gmra.mxu3 %v594_v26 }
 0x106   : > { %865 = vmatmul.f32.vlgmr.msrb.gmra.mxu2 %v593_v21 }
 0x10c   : > { %885 = vmatmul.f32.vlgmr.msrb.gmra.mxu3 %v594_v26 }
 0x16e   : > { %v746_v28 = vpop.f32.mrf.mxu0 }
 0x16f   : > { %v747_v31 = vadd.f32 %v746_v28, %v725_v29 }
 0x170   : > { %v766_v30 = vpop.f32.mrf.mxu1 }
 0x171   : > { %v767_v33 = vadd.f32 %v766_v30, %v747_v31 }
 0x176   : > { %v826_v35 = vpop.f32.mrf.mxu0 }
 0x177   : > { %v827_v38 = vadd.f32 %v826_v35, %v726_v34 }
 0x178   : > { %v846_v40 = vpop.f32.mrf.mxu1 }
 0x179   : > { %v847_v42 = vadd.f32 %v846_v40, %v827_v38 }
 0x181   : > { %v786_v32 = vpop.f32.mrf.mxu2 }
 0x182   : > { %v787_v36 = vadd.f32 %v786_v32, %v767_v33 }
 0x187   : > { %v806_v37 = vpop.f32.mrf.mxu3 }
 0x188   : > { %v807_v39 = vadd.f32 %v806_v37, %v787_v36 }
 0x189   : > { %v866_v41 = vpop.f32.mrf.mxu2 }
 0x18a   : > { %889 = vst [vmem:[%s290_s16] sm:$0xff] %v807_v39  ;;  %v867_v43 = vadd.f32 %v866_v41, %v847_v42 }
 0x18f   : > { %v886_v44 = vpop.f32.mrf.mxu3 }
 0x190   : > { %v887_v45 = vadd.f32 %v886_v44, %v867_v43 }
 0x192   : > { %890 = vst [vmem:[%s290_s16 + $0x8] sm:$0xff] %v887_v45 }
 0x193   : > { %1257 = shalt.err (!%p1254_p9)
}
 0x194   : > { %1043 = dma.vmem_to_hbm [thread:$0]  (%p1419_p13), %s906_s28, 256, %s908_s10, %s892_s25  }
 0x195 PF: > { %s919_s7 = sand.u32 1, %s1292_s18   ;;  %p1534_p10 = scmp.ge.s32.totalorder %s1304_s21, 2 }
 0x196   : > { %s920_s30 = scalar_lea.sflag [#allocation4], %s919_s7 }
 0x197   : > { %p1060_p11 = pnand %p1534_p10, %p1424_p4 }
 0x199   : > { %p1061_p0 = pneg %p1060_p11 }
 0x19b   : > { %1287 = dma.done.wait (%p1061_p0), %s920_s30, 256  }
 0x19c   : > { %1289 = vsyncadd (%p1061_p0), %s920_s30, 4294967040  ;;  %p20_p2 = scmp.ge.s32.totalorder %s1399_s24, 4   ;;  %s1535_s18 = smov %s1296_s19 }
 0x19d   : > { %s1536_s19 = smov %s1300_s20  ;;  %s1537_s20 = smov %s1411_s29 }
 0x19e   : > { %s1538_s21 = smov %s1399_s24  ;;  %22 = sbr.rel (!%p20_p2) target bundleno = 7 (0x7), region = 97 }
 0x1a3   :  { %926 = vsyncpa [#allocation3], 1 }
 0x1a4   :  { %928 = vsyncpa [#allocation3 + $0x1], 1 }
 0x1a5   :  { %929 = vsyncpa [#allocation6], 1 }
 0x1a6   :  { %930 = vsyncpa [#allocation9], 1 }
 0x1a7   :  { %931 = vsyncpa [#allocation4], 1 }
 0x1a8   :  { %933 = vsyncpa [#allocation4 + $0x1], 1 }

</bundles_post_ra>
